<compile_context>
chip_gen: v7x
topology: tpu7x:2x2x1
jax: 0.10.0
libtpu: 0.0.40
codegen_flags: <defaults>
</compile_context>

<pallas_src>
import functools

import jax
import jax.numpy as jnp
from jax import lax
from jax.experimental import pallas as pl
from jax.experimental.pallas import tpu as pltpu


def mhsa_kernel(x_ref, gamma_ref, beta_ref, wq_ref, wkv_ref, wo_ref,
                o_ref,
                xn_scr, k_scr, v_scr, q_scr, ctx_scr,
                *, num_heads: int, head_dim: int, eps: float, tq: int, tk: int):
    H, hd = num_heads, head_dim
    S = k_scr.shape[1]
    qi = pl.program_id(1)

    # ---- Prologue (once per batch element): LayerNorm + packed K/V proj ----
    @pl.when(qi == 0)
    def _prologue():
        x = x_ref[0].astype(jnp.float32)                         # (S, D)
        mean = jnp.mean(x, axis=-1, keepdims=True)
        xc = x - mean
        var = jnp.mean(xc * xc, axis=-1, keepdims=True)
        # fused LN: xc * (gamma * rsqrt(var + eps)) + beta
        xn = xc * (gamma_ref[...] * lax.rsqrt(var + eps)) + beta_ref[...]
        xn = xn.astype(xn_scr.dtype)
        xn_scr[...] = xn

        # One packed (S, D) @ (D, 2*hd) matmul per head (K and V fused: double
        # the MXU output-width fill, half the pushes/pops/stores).
        @pl.loop(0, H)
        def _kv(h):
            kv = jnp.dot(xn, wkv_ref[h],
                         preferred_element_type=jnp.float32)     # (S, 2*hd)
            k_scr[h] = kv[:, :hd].astype(k_scr.dtype)
            v_scr[h] = kv[:, hd:].astype(v_scr.dtype)

    # ---- Per query tile ----
    start = qi * tq
    if tq % 8 == 0:
        start = pl.multiple_of(start, 8)
    xn_q = xn_scr[pl.ds(start, tq), :]                           # (TQ, D)

    # Per-head Q projection (1/sqrt(hd) already folded into wq).
    @pl.loop(0, H)
    def _q(h):
        q_scr[h] = jnp.dot(xn_q, wq_ref[h],
                           preferred_element_type=jnp.float32).astype(q_scr.dtype)

    q = q_scr[...]                                               # (H, TQ, hd)

    # ---- Flash-style online softmax over key tiles of size TK ----
    num_kv = S // tk

    def kv_step(ki, carry):
        m_i, l_i, acc = carry
        ks = ki * tk
        if tk % 8 == 0:
            ks = pl.multiple_of(ks, 8)
        k = k_scr[:, pl.ds(ks, tk), :]                           # (H, TK, hd)
        v = v_scr[:, pl.ds(ks, tk), :]                           # (H, TK, hd)
        # Scores, batched over heads; the K "transpose" is folded into the
        # contraction dims (rhs-transposed form is MXU-native).
        s = jnp.einsum("hqd,hkd->hqk", q, k,
                       preferred_element_type=jnp.float32)       # (H, TQ, TK)
        m_new = jnp.maximum(m_i, jnp.max(s, axis=-1, keepdims=True))
        alpha = jnp.exp(m_i - m_new)
        p = jnp.exp(s - m_new)
        l_new = alpha * l_i + jnp.sum(p, axis=-1, keepdims=True)
        acc_new = alpha * acc + jnp.einsum("hqk,hkd->hqd", p.astype(v.dtype), v,
                                           preferred_element_type=jnp.float32)
        return m_new, l_new, acc_new

    m0 = jnp.full((H, tq, 1), -jnp.inf, dtype=jnp.float32)
    l0 = jnp.zeros((H, tq, 1), dtype=jnp.float32)
    a0 = jnp.zeros((H, tq, hd), dtype=jnp.float32)
    if num_kv == 1:
        _, l_f, acc_f = kv_step(0, (m0, l0, a0))
    else:
        _, l_f, acc_f = lax.fori_loop(0, num_kv, kv_step, (m0, l0, a0))

    # Fold softmax denominator into the small context (hd muls per row instead
    # of S) using the EUP approximate reciprocal.
    ctx = (acc_f * pl.reciprocal(l_f, approx=True)).astype(ctx_scr.dtype)

    # Pack heads along the lane axis of a (TQ, D) scratch so the output
    # projection is a single deep-K (K = D) matmul -- no (H, TQ, D) temporary,
    # no per-head shallow matmuls, no head-sum.
    for h in range(H):
        ctx_scr[:, h * hd:(h + 1) * hd] = ctx[h]
    out = jnp.dot(ctx_scr[...], wo_ref[...],
                  preferred_element_type=jnp.float32)            # (TQ, D)
    o_ref[0] = out.astype(o_ref.dtype)


def _pick_tile(S: int, max_tile: int) -> int:
    """Largest multiple-of-8 divisor of S that is <= max_tile, else S."""
    if S <= max_tile:
        return S
    for t in range(max_tile - max_tile % 8, 7, -8):
        if S % t == 0:
            return t
    return S


def _ceil_to(n: int, m: int) -> int:
    return -(-n // m) * m


def _vmem_estimate(S, D, H, hd, tq, tk, x_itemsize, c_itemsize):
    lp = lambda n: _ceil_to(max(n, 1), 128)
    sp = lambda n: _ceil_to(max(n, 1), 8)
    est = 0
    # Pipelined input/output blocks (double-buffered).
    est += 2 * sp(S) * lp(D) * x_itemsize                     # x block
    est += 2 * sp(tq) * lp(D) * x_itemsize                    # out block
    est += 2 * 2 * sp(1) * lp(D) * 4                          # gamma, beta
    # Resident weights (still double-buffered by the pipeline).
    w = H * sp(D) * (lp(hd) + lp(2 * hd)) + sp(D) * lp(D)
    est += 2 * w * c_itemsize
    # VMEM scratch: xn, K, V, Q, ctx.
    scr = (sp(S) * lp(D) + 2 * H * sp(S) * lp(hd)
           + H * sp(tq) * lp(hd) + sp(tq) * lp(D))
    est += scr * c_itemsize
    # f32 temporaries: s & p (H,TQ,TK); q/acc/ctx (H,TQ,hd); out (TQ,D).
    est += (2 * H * sp(tq) * lp(tk) + 3 * H * sp(tq) * lp(hd) + sp(tq) * lp(D)) * 4
    return est


def mhsa_pallas(x, gamma, beta, in_proj_weight, out_proj_weight, *, num_heads,
                eps: float = 1e-5, tq_max: int = 256, tk_max: int = 512,
                compute_dtype=None):
    """Forward pass of MHSA: MultiheadAttention(LayerNorm(x), ...), batch_first.

    x:               (B, S, D)
    gamma, beta:     (D,)        LayerNorm affine parameters
    in_proj_weight:  (3D, D)     packed [Wq; Wk; Wv] (PyTorch layout)
    out_proj_weight: (D, D)
    compute_dtype:   dtype for MXU operands / scratch; defaults to bfloat16
                     when x is f32 (LN / softmax stats stay in f32).
    """
    B, S, D = x.shape
    H = num_heads
    hd = D // H
    assert hd * H == D, "dim must be divisible by num_heads"
    if compute_dtype is None:
        compute_dtype = jnp.bfloat16 if x.dtype == jnp.float32 else x.dtype

    # --- One-time host-side weight reorganisation (leading head axis) ---
    wq_full, wk_full, wv_full = jnp.split(in_proj_weight, 3, axis=0)  # (D, D)

    def per_head(w):                      # (D_out, D_in) -> (H, D_in, hd)
        return jnp.transpose(w.reshape(H, hd, D), (0, 2, 1))

    scale = 1.0 / float(hd) ** 0.5
    wq = (per_head(wq_full) * scale).astype(compute_dtype)      # (H, D, hd)
    wkv = jnp.concatenate([per_head(wk_full), per_head(wv_full)],
                          axis=-1).astype(compute_dtype)        # (H, D, 2*hd)
    wo = out_proj_weight.T.astype(compute_dtype)                # (D, D)
    gamma2 = gamma.reshape(1, D).astype(jnp.float32)
    beta2 = beta.reshape(1, D).astype(jnp.float32)

    tq = _pick_tile(S, tq_max)
    tk = _pick_tile(S, tk_max)
    num_q = S // tq

    # --- Generation-aware VMEM budget ---
    est = _vmem_estimate(S, D, H, hd, tq, tk,
                         jnp.dtype(x.dtype).itemsize,
                         jnp.dtype(compute_dtype).itemsize)
    cap = 56 << 20                         # conservative (fits v7x 64 MiB)
    try:
        hw = getattr(pltpu.get_tpu_info(), "vmem_capacity_bytes", None)
        if hw:
            cap = int(hw * 0.85)           # ~54 MiB on v7x, ~108 MiB on v5e/v6e
    except Exception:
        pass
    vmem_limit_bytes = int(min(max(int(est * 1.25), 16 << 20), cap))

    kern = functools.partial(mhsa_kernel, num_heads=H, head_dim=hd, eps=eps,
                             tq=tq, tk=tk)
    return pl.pallas_call(
        kern,
        out_shape=jax.ShapeDtypeStruct((B, S, D), x.dtype),
        grid=(B, num_q),
        in_specs=[
            # Full sequence for this batch element; constant in qi, so it is
            # only re-DMA'd when b changes.
            pl.BlockSpec((1, S, D), lambda b, q: (b, 0, 0)),
            pl.BlockSpec((1, D), lambda b, q: (0, 0)),
            pl.BlockSpec((1, D), lambda b, q: (0, 0)),
            # Weights: constant index maps -> DMA'd once, stay resident.
            pl.BlockSpec((H, D, hd), lambda b, q: (0, 0, 0)),
            pl.BlockSpec((H, D, 2 * hd), lambda b, q: (0, 0, 0)),
            pl.BlockSpec((D, D), lambda b, q: (0, 0)),
        ],
        out_specs=pl.BlockSpec((1, tq, D), lambda b, q: (b, q, 0)),
        scratch_shapes=[
            pltpu.VMEM((S, D), compute_dtype),         # xn (LayerNorm output)
            pltpu.VMEM((H, S, hd), compute_dtype),     # K, per head
            pltpu.VMEM((H, S, hd), compute_dtype),     # V, per head
            pltpu.VMEM((H, tq, hd), compute_dtype),    # Q for the current tile
            pltpu.VMEM((tq, D), compute_dtype),        # head-packed context
        ],
        compiler_params=pltpu.CompilerParams(
            # b is parallel (megacore-shardable); qi must stay sequential
            # because LN / K / V scratch is computed at qi == 0 and reused.
            dimension_semantics=("parallel", "arbitrary"),
            vmem_limit_bytes=vmem_limit_bytes,
        ),
    )(x, gamma2, beta2, wq, wkv, wo)


def mhsa_reference(x, gamma, beta, in_proj_weight, out_proj_weight, *,
                   num_heads, eps=1e-5):
    """Pure-JAX reference matching torch.nn.LayerNorm + MultiheadAttention."""
    B, S, D = x.shape
    hd = D // num_heads
    mean = jnp.mean(x, axis=-1, keepdims=True)
    var = jnp.mean((x - mean) ** 2, axis=-1, keepdims=True)
    xn = (x - mean) / jnp.sqrt(var + eps) * gamma + beta

    qkv = xn @ in_proj_weight.T                        # (B, S, 3D)
    q, k, v = jnp.split(qkv, 3, axis=-1)
    q = q.reshape(B, S, num_heads, hd).transpose(0, 2, 1, 3)
    k = k.reshape(B, S, num_heads, hd).transpose(0, 2, 1, 3)
    v = v.reshape(B, S, num_heads, hd).transpose(0, 2, 1, 3)
    s = jnp.einsum("bhqd,bhkd->bhqk", q, k) / jnp.sqrt(hd)
    p = jax.nn.softmax(s, axis=-1)
    o = jnp.einsum("bhqk,bhkd->bhqd", p, v)
    o = o.transpose(0, 2, 1, 3).reshape(B, S, D)
    return o @ out_proj_weight.T


if __name__ == "__main__":
    key = jax.random.PRNGKey(0)
    kx1, kx2, kin, kout = jax.random.split(key, 4)

    D, H = 32, 4
    gamma = jnp.ones((D,), dtype=jnp.float32)
    beta = jnp.zeros((D,), dtype=jnp.float32)
    in_proj_weight = jax.random.normal(kin, (3 * D, D), dtype=jnp.float32) * 0.1
    out_proj_weight = jax.random.normal(kout, (D, D), dtype=jnp.float32) * 0.1

    # Test 1: f32 compute path, single q / kv tile (B=2, S=8).
    x1 = jax.random.normal(kx1, (2, 8, D), dtype=jnp.float32)
    y1 = jax.block_until_ready(
        mhsa_pallas(x1, gamma, beta, in_proj_weight, out_proj_weight,
                    num_heads=H, compute_dtype=jnp.float32))
    r1 = mhsa_reference(x1, gamma, beta, in_proj_weight, out_proj_weight,
                        num_heads=H)
    assert jnp.allclose(y1, r1, atol=5e-3, rtol=5e-3), "Pallas MHSA mismatch (test 1)"

    # Test 2: default bf16 compute, multiple q tiles AND multiple kv tiles
    # (B=2, S=16, TQ=TK=8) -> exercises the scratch carry across q tiles and
    # the flash-style online-softmax loop over key tiles.
    x2 = jax.random.normal(kx2, (2, 16, D), dtype=jnp.float32)
    y2 = jax.block_until_ready(
        mhsa_pallas(x2, gamma, beta, in_proj_weight, out_proj_weight,
                    num_heads=H, tq_max=8, tk_max=8))
    r2 = mhsa_reference(x2, gamma, beta, in_proj_weight, out_proj_weight,
                        num_heads=H)
    assert jnp.allclose(y2, r2, atol=5e-2, rtol=5e-2), "Pallas MHSA mismatch (test 2)"

    print("KERNEL_OK")
</pallas_src>

<mosaic_0001>
module attributes {stable_mosaic.version = 11 : i64} {
  func.func @mhsa_kernel(%arg0: i32, %arg1: i32, %arg2: memref<1x8x32xf32, #tpu.memory_space<vmem>>, %arg3: memref<1x32xf32, #tpu.memory_space<vmem>>, %arg4: memref<1x32xf32, #tpu.memory_space<vmem>>, %arg5: memref<4x32x8xf32, #tpu.memory_space<vmem>>, %arg6: memref<4x32x16xf32, #tpu.memory_space<vmem>>, %arg7: memref<32x32xf32, #tpu.memory_space<vmem>>, %arg8: memref<1x8x32xf32, #tpu.memory_space<vmem>>, %arg9: memref<8x32xf32, #tpu.memory_space<vmem>>, %arg10: memref<4x8x8xf32, #tpu.memory_space<vmem>>, %arg11: memref<4x8x8xf32, #tpu.memory_space<vmem>>, %arg12: memref<4x8x8xf32, #tpu.memory_space<vmem>>, %arg13: memref<8x32xf32, #tpu.memory_space<vmem>>) attributes {dimension_semantics = [#tpu.dimension_semantics<parallel>, #tpu.dimension_semantics<arbitrary>], iteration_bounds = array<i64: 2, 1>, scalar_prefetch = 0 : i64, scratch_operands = 5 : i64, tpu.core_type = #tpu.core_type<tc>, window_params = [{transform_indices = @transform_0, window_bounds = array<i64: 1, 8, 32>}, {pipeline_mode = #tpu.pipeline_mode<synchronous>, transform_indices = @transform_1, window_bounds = array<i64: 1, 32>}, {pipeline_mode = #tpu.pipeline_mode<synchronous>, transform_indices = @transform_2, window_bounds = array<i64: 1, 32>}, {pipeline_mode = #tpu.pipeline_mode<synchronous>, transform_indices = @transform_3, window_bounds = array<i64: 4, 32, 8>}, {pipeline_mode = #tpu.pipeline_mode<synchronous>, transform_indices = @transform_4, window_bounds = array<i64: 4, 32, 16>}, {pipeline_mode = #tpu.pipeline_mode<synchronous>, transform_indices = @transform_5, window_bounds = array<i64: 32, 32>}, {transform_indices = @transform_6, window_bounds = array<i64: 1, 8, 32>}]} {
    %c0_i32 = arith.constant 0 : i32
    %0 = arith.cmpi eq, %arg1, %c0_i32 : i32
    %1 = arith.extui %0 : i1 to i32
    %c0_i32_0 = arith.constant 0 : i32
    %2 = arith.cmpi ne, %1, %c0_i32_0 : i32
    scf.if %2 {
      %c0_30 = arith.constant 0 : index
      %c0_31 = arith.constant 0 : index
      %c0_32 = arith.constant 0 : index
      %55 = vector.load %arg2[%c0_30, %c0_31, %c0_32] : memref<1x8x32xf32, #tpu.memory_space<vmem>>, vector<1x8x32xf32>
      %56 = vector.shape_cast %55 : vector<1x8x32xf32> to vector<8x32xf32>
      %cst_33 = arith.constant dense<0.000000e+00> : vector<8xf32>
      %57 = vector.multi_reduction <add>, %56, %cst_33 [1] : vector<8x32xf32> to vector<8xf32>
      %58 = vector.shape_cast %57 : vector<8xf32> to vector<8x1xf32>
      %cst_34 = arith.constant 3.200000e+01 : f32
      %59 = vector.broadcast %cst_34 : f32 to vector<8x1xf32>
      %60 = arith.divf %58, %59 : vector<8x1xf32>
      %61 = vector.broadcast %60 : vector<8x1xf32> to vector<8x32xf32>
      %62 = arith.subf %56, %61 : vector<8x32xf32>
      %63 = arith.mulf %62, %62 : vector<8x32xf32>
      %cst_35 = arith.constant dense<0.000000e+00> : vector<8xf32>
      %64 = vector.multi_reduction <add>, %63, %cst_35 [1] : vector<8x32xf32> to vector<8xf32>
      %65 = vector.shape_cast %64 : vector<8xf32> to vector<8x1xf32>
      %cst_36 = arith.constant 3.200000e+01 : f32
      %66 = vector.broadcast %cst_36 : f32 to vector<8x1xf32>
      %67 = arith.divf %65, %66 : vector<8x1xf32>
      %c0_37 = arith.constant 0 : index
      %c0_38 = arith.constant 0 : index
      %68 = vector.load %arg3[%c0_37, %c0_38] : memref<1x32xf32, #tpu.memory_space<vmem>>, vector<1x32xf32>
      %cst_39 = arith.constant 9.99999974E-6 : f32
      %69 = vector.broadcast %cst_39 : f32 to vector<8x1xf32>
      %70 = arith.addf %67, %69 : vector<8x1xf32>
      %71 = math.rsqrt %70 : vector<8x1xf32>
      %72 = vector.broadcast %68 : vector<1x32xf32> to vector<8x32xf32>
      %73 = vector.broadcast %71 : vector<8x1xf32> to vector<8x32xf32>
      %74 = arith.mulf %72, %73 : vector<8x32xf32>
      %75 = arith.mulf %62, %74 : vector<8x32xf32>
      %c0_40 = arith.constant 0 : index
      %c0_41 = arith.constant 0 : index
      %76 = vector.load %arg4[%c0_40, %c0_41] : memref<1x32xf32, #tpu.memory_space<vmem>>, vector<1x32xf32>
      %77 = vector.broadcast %76 : vector<1x32xf32> to vector<8x32xf32>
      %78 = arith.addf %75, %77 : vector<8x32xf32>
      %c0_42 = arith.constant 0 : index
      %c0_43 = arith.constant 0 : index
      %79 = vector.load %arg9[%c0_42, %c0_43] : memref<8x32xf32, #tpu.memory_space<vmem>>, vector<8x32xf32>
      tpu.vector_store %arg9[%c0_42, %c0_43], %78 {strides = array<i32>} : memref<8x32xf32, #tpu.memory_space<vmem>>, vector<8x32xf32>,
      %c0_i32_44 = arith.constant 0 : i32
      %c4_i32_45 = arith.constant 4 : i32
      %80 = arith.addi %c0_i32_44, %c4_i32_45 : i32
      %c1_i32_46 = arith.constant 1 : i32
      scf.for %arg14 = %c0_i32_44 to %80 step %c1_i32_46  : i32 {
        %c1_i32_48 = arith.constant 1 : i32
        %81 = arith.muli %arg14, %c1_i32_48 : i32
        %c0_i32_49 = arith.constant 0 : i32
        %82 = arith.addi %c0_i32_49, %81 : i32
        %83 = arith.index_cast %82 : i32 to index
        %c0_50 = arith.constant 0 : index
        %c0_51 = arith.constant 0 : index
        %84 = vector.load %arg6[%83, %c0_50, %c0_51] : memref<4x32x16xf32, #tpu.memory_space<vmem>>, vector<1x32x16xf32>
        %85 = vector.shape_cast %84 : vector<1x32x16xf32> to vector<32x16xf32>
        %cst_52 = arith.constant dense<0.000000e+00> : vector<8x16xf32>
        %86 = tpu.matmul %78, %85, %cst_52 {dimension_numbers = #tpu.dot_dimension_numbers<[1], [0], [0], [1], [0, 0, 1, 1], [], []>} : vector<8x32xf32>, vector<32x16xf32>, vector<8x16xf32> -> vector<8x16xf32>
        %87 = vector.extract_strided_slice %86 {offsets = [0, 0], sizes = [8, 8], strides = [1, 1]} : vector<8x16xf32> to vector<8x8xf32>
        %88 = arith.index_cast %82 : i32 to index
        %c0_53 = arith.constant 0 : index
        %c0_54 = arith.constant 0 : index
        %89 = vector.load %arg10[%88, %c0_53, %c0_54] : memref<4x8x8xf32, #tpu.memory_space<vmem>>, vector<1x8x8xf32>
        %90 = vector.shape_cast %89 : vector<1x8x8xf32> to vector<8x8xf32>
        %91 = vector.shape_cast %87 : vector<8x8xf32> to vector<1x8x8xf32>
        tpu.vector_store %arg10[%88, %c0_53, %c0_54], %91 {strides = array<i32>} : memref<4x8x8xf32, #tpu.memory_space<vmem>>, vector<1x8x8xf32>,
        %92 = vector.extract_strided_slice %86 {offsets = [0, 8], sizes = [8, 8], strides = [1, 1]} : vector<8x16xf32> to vector<8x8xf32>
        %93 = arith.index_cast %82 : i32 to index
        %c0_55 = arith.constant 0 : index
        %c0_56 = arith.constant 0 : index
        %94 = vector.load %arg11[%93, %c0_55, %c0_56] : memref<4x8x8xf32, #tpu.memory_space<vmem>>, vector<1x8x8xf32>
        %95 = vector.shape_cast %94 : vector<1x8x8xf32> to vector<8x8xf32>
        %96 = vector.shape_cast %92 : vector<8x8xf32> to vector<1x8x8xf32>
        tpu.vector_store %arg11[%93, %c0_55, %c0_56], %96 {strides = array<i32>} : memref<4x8x8xf32, #tpu.memory_space<vmem>>, vector<1x8x8xf32>,
      }
      %c4_i32_47 = arith.constant 4 : i32
    } else {
    }
    %c8_i32 = arith.constant 8 : i32
    %3 = arith.muli %arg1, %c8_i32 : i32
    %4 = tpu.assume_multiple %3, 8 : i32
    %5 = arith.index_cast %4 : i32 to index
    %c0 = arith.constant 0 : index
    %6 = vector.load %arg9[%5, %c0] : memref<8x32xf32, #tpu.memory_space<vmem>>, vector<8x32xf32>
    %c0_i32_1 = arith.constant 0 : i32
    %c4_i32 = arith.constant 4 : i32
    %7 = arith.addi %c0_i32_1, %c4_i32 : i32
    %c1_i32 = arith.constant 1 : i32
    scf.for %arg14 = %c0_i32_1 to %7 step %c1_i32  : i32 {
      %c1_i32_30 = arith.constant 1 : i32
      %55 = arith.muli %arg14, %c1_i32_30 : i32
      %c0_i32_31 = arith.constant 0 : i32
      %56 = arith.addi %c0_i32_31, %55 : i32
      %57 = arith.index_cast %56 : i32 to index
      %c0_32 = arith.constant 0 : index
      %c0_33 = arith.constant 0 : index
      %58 = vector.load %arg5[%57, %c0_32, %c0_33] : memref<4x32x8xf32, #tpu.memory_space<vmem>>, vector<1x32x8xf32>
      %59 = vector.shape_cast %58 : vector<1x32x8xf32> to vector<32x8xf32>
      %cst_34 = arith.constant dense<0.000000e+00> : vector<8x8xf32>
      %60 = tpu.matmul %6, %59, %cst_34 {dimension_numbers = #tpu.dot_dimension_numbers<[1], [0], [0], [1], [0, 0, 1, 1], [], []>} : vector<8x32xf32>, vector<32x8xf32>, vector<8x8xf32> -> vector<8x8xf32>
      %61 = arith.index_cast %56 : i32 to index
      %c0_35 = arith.constant 0 : index
      %c0_36 = arith.constant 0 : index
      %62 = vector.load %arg12[%61, %c0_35, %c0_36] : memref<4x8x8xf32, #tpu.memory_space<vmem>>, vector<1x8x8xf32>
      %63 = vector.shape_cast %62 : vector<1x8x8xf32> to vector<8x8xf32>
      %64 = vector.shape_cast %60 : vector<8x8xf32> to vector<1x8x8xf32>
      tpu.vector_store %arg12[%61, %c0_35, %c0_36], %64 {strides = array<i32>} : memref<4x8x8xf32, #tpu.memory_space<vmem>>, vector<1x8x8xf32>,
    }
    %c4_i32_2 = arith.constant 4 : i32
    %c0_3 = arith.constant 0 : index
    %c0_4 = arith.constant 0 : index
    %c0_5 = arith.constant 0 : index
    %8 = vector.load %arg12[%c0_3, %c0_4, %c0_5] : memref<4x8x8xf32, #tpu.memory_space<vmem>>, vector<4x8x8xf32>
    %cst = arith.constant 0xFF800000 : f32
    %9 = vector.broadcast %cst : f32 to vector<4x8x1xf32>
    %cst_6 = arith.constant 0.000000e+00 : f32
    %10 = vector.broadcast %cst_6 : f32 to vector<4x8x1xf32>
    %cst_7 = arith.constant 0.000000e+00 : f32
    %11 = vector.broadcast %cst_7 : f32 to vector<4x8x8xf32>
    %c0_i32_8 = arith.constant 0 : i32
    %12 = tpu.assume_multiple %c0_i32_8, 8 : i32
    %c0_9 = arith.constant 0 : index
    %13 = arith.index_cast %12 : i32 to index
    %c0_10 = arith.constant 0 : index
    %14 = vector.load %arg10[%c0_9, %13, %c0_10] : memref<4x8x8xf32, #tpu.memory_space<vmem>>, vector<4x8x8xf32>
    %c0_11 = arith.constant 0 : index
    %15 = arith.index_cast %12 : i32 to index
    %c0_12 = arith.constant 0 : index
    %16 = vector.load %arg11[%c0_11, %15, %c0_12] : memref<4x8x8xf32, #tpu.memory_space<vmem>>, vector<4x8x8xf32>
    "tpu.trace_start"() <{level = 10 : i32, message = "hqd,hkd->hqk"}> : () -> ()
    %cst_13 = arith.constant dense<0.000000e+00> : vector<4x8x8xf32>
    %17 = tpu.matmul %8, %14, %cst_13 {dimension_numbers = #tpu.dot_dimension_numbers<[2], [2], [1], [1], [0, 0, 0, 1, 1, 1], [0], [0]>} : vector<4x8x8xf32>, vector<4x8x8xf32>, vector<4x8x8xf32> -> vector<4x8x8xf32>
    "tpu.trace_stop"() : () -> ()
    %cst_14 = arith.constant dense<0xFF800000> : vector<4x8xf32>
    %18 = vector.multi_reduction <maximumf>, %17, %cst_14 [2] : vector<4x8x8xf32> to vector<4x8xf32>
    %19 = vector.shape_cast %18 : vector<4x8xf32> to vector<4x8x1xf32>
    %20 = arith.maximumf %9, %19 : vector<4x8x1xf32>
    %21 = arith.subf %9, %20 : vector<4x8x1xf32>
    %22 = math.exp %21 : vector<4x8x1xf32>
    %23 = vector.broadcast %20 : vector<4x8x1xf32> to vector<4x8x8xf32>
    %24 = arith.subf %17, %23 : vector<4x8x8xf32>
    %25 = math.exp %24 : vector<4x8x8xf32>
    %26 = arith.mulf %22, %10 : vector<4x8x1xf32>
    %cst_15 = arith.constant dense<0.000000e+00> : vector<4x8xf32>
    %27 = vector.multi_reduction <add>, %25, %cst_15 [2] : vector<4x8x8xf32> to vector<4x8xf32>
    %28 = vector.shape_cast %27 : vector<4x8xf32> to vector<4x8x1xf32>
    %29 = arith.addf %26, %28 : vector<4x8x1xf32>
    %30 = vector.broadcast %22 : vector<4x8x1xf32> to vector<4x8x8xf32>
    %31 = arith.mulf %30, %11 : vector<4x8x8xf32>
    "tpu.trace_start"() <{level = 10 : i32, message = "hqk,hkd->hqd"}> : () -> ()
    %cst_16 = arith.constant dense<0.000000e+00> : vector<4x8x8xf32>
    %32 = tpu.matmul %25, %16, %cst_16 {dimension_numbers = #tpu.dot_dimension_numbers<[2], [1], [1], [2], [0, 0, 0, 1, 1, 2], [0], [0]>} : vector<4x8x8xf32>, vector<4x8x8xf32>, vector<4x8x8xf32> -> vector<4x8x8xf32>
    "tpu.trace_stop"() : () -> ()
    %33 = arith.addf %31, %32 : vector<4x8x8xf32>
    %34 = tpu.reciprocal %29 {approx = true} : vector<4x8x1xf32> -> vector<4x8x1xf32>
    %35 = vector.broadcast %34 : vector<4x8x1xf32> to vector<4x8x8xf32>
    %36 = arith.mulf %33, %35 : vector<4x8x8xf32>
    %37 = vector.extract_strided_slice %36 {offsets = [0, 0, 0], sizes = [1, 8, 8], strides = [1, 1, 1]} : vector<4x8x8xf32> to vector<1x8x8xf32>
    %38 = vector.shape_cast %37 : vector<1x8x8xf32> to vector<8x8xf32>
    %c0_17 = arith.constant 0 : index
    %c0_18 = arith.constant 0 : index
    %39 = vector.load %arg13[%c0_17, %c0_18] : memref<8x32xf32, #tpu.memory_space<vmem>>, vector<8x8xf32>
    tpu.vector_store %arg13[%c0_17, %c0_18], %38 {strides = array<i32>} : memref<8x32xf32, #tpu.memory_space<vmem>>, vector<8x8xf32>,
    %40 = vector.extract_strided_slice %36 {offsets = [1, 0, 0], sizes = [1, 8, 8], strides = [1, 1, 1]} : vector<4x8x8xf32> to vector<1x8x8xf32>
    %41 = vector.shape_cast %40 : vector<1x8x8xf32> to vector<8x8xf32>
    %c0_19 = arith.constant 0 : index
    %c8 = arith.constant 8 : index
    %42 = vector.load %arg13[%c0_19, %c8] : memref<8x32xf32, #tpu.memory_space<vmem>>, vector<8x8xf32>
    tpu.vector_store %arg13[%c0_19, %c8], %41 {strides = array<i32>} : memref<8x32xf32, #tpu.memory_space<vmem>>, vector<8x8xf32>,
    %43 = vector.extract_strided_slice %36 {offsets = [2, 0, 0], sizes = [1, 8, 8], strides = [1, 1, 1]} : vector<4x8x8xf32> to vector<1x8x8xf32>
    %44 = vector.shape_cast %43 : vector<1x8x8xf32> to vector<8x8xf32>
    %c0_20 = arith.constant 0 : index
    %c16 = arith.constant 16 : index
    %45 = vector.load %arg13[%c0_20, %c16] : memref<8x32xf32, #tpu.memory_space<vmem>>, vector<8x8xf32>
    tpu.vector_store %arg13[%c0_20, %c16], %44 {strides = array<i32>} : memref<8x32xf32, #tpu.memory_space<vmem>>, vector<8x8xf32>,
    %46 = vector.extract_strided_slice %36 {offsets = [3, 0, 0], sizes = [1, 8, 8], strides = [1, 1, 1]} : vector<4x8x8xf32> to vector<1x8x8xf32>
    %47 = vector.shape_cast %46 : vector<1x8x8xf32> to vector<8x8xf32>
    %c0_21 = arith.constant 0 : index
    %c24 = arith.constant 24 : index
    %48 = vector.load %arg13[%c0_21, %c24] : memref<8x32xf32, #tpu.memory_space<vmem>>, vector<8x8xf32>
    tpu.vector_store %arg13[%c0_21, %c24], %47 {strides = array<i32>} : memref<8x32xf32, #tpu.memory_space<vmem>>, vector<8x8xf32>,
    %c0_22 = arith.constant 0 : index
    %c0_23 = arith.constant 0 : index
    %49 = vector.load %arg13[%c0_22, %c0_23] : memref<8x32xf32, #tpu.memory_space<vmem>>, vector<8x32xf32>
    %c0_24 = arith.constant 0 : index
    %c0_25 = arith.constant 0 : index
    %50 = vector.load %arg7[%c0_24, %c0_25] : memref<32x32xf32, #tpu.memory_space<vmem>>, vector<32x32xf32>
    %cst_26 = arith.constant dense<0.000000e+00> : vector<8x32xf32>
    %51 = tpu.matmul %49, %50, %cst_26 {dimension_numbers = #tpu.dot_dimension_numbers<[1], [0], [0], [1], [0, 0, 1, 1], [], []>} : vector<8x32xf32>, vector<32x32xf32>, vector<8x32xf32> -> vector<8x32xf32>
    %c0_27 = arith.constant 0 : index
    %c0_28 = arith.constant 0 : index
    %c0_29 = arith.constant 0 : index
    %52 = vector.load %arg8[%c0_27, %c0_28, %c0_29] : memref<1x8x32xf32, #tpu.memory_space<vmem>>, vector<1x8x32xf32>
    %53 = vector.shape_cast %52 : vector<1x8x32xf32> to vector<8x32xf32>
    %54 = vector.shape_cast %51 : vector<8x32xf32> to vector<1x8x32xf32>
    tpu.vector_store %arg8[%c0_27, %c0_28, %c0_29], %54 {strides = array<i32>} : memref<1x8x32xf32, #tpu.memory_space<vmem>>, vector<1x8x32xf32>,
    return
  }
  func.func @transform_0(%arg0: i32, %arg1: i32) -> (i32, i32, i32) {
    %c0_i32 = arith.constant 0 : i32
    %c0_i32_0 = arith.constant 0 : i32
    %c0_i32_1 = arith.constant 0 : i32
    return %arg0, %c0_i32, %c0_i32_0 : i32, i32, i32
  }
  func.func @transform_1(%arg0: i32, %arg1: i32) -> (i32, i32) {
    %c0_i32 = arith.constant 0 : i32
    %c0_i32_0 = arith.constant 0 : i32
    %c0_i32_1 = arith.constant 0 : i32
    return %c0_i32, %c0_i32_0 : i32, i32
  }
  func.func @transform_2(%arg0: i32, %arg1: i32) -> (i32, i32) {
    %c0_i32 = arith.constant 0 : i32
    %c0_i32_0 = arith.constant 0 : i32
    %c0_i32_1 = arith.constant 0 : i32
    return %c0_i32, %c0_i32_0 : i32, i32
  }
  func.func @transform_3(%arg0: i32, %arg1: i32) -> (i32, i32, i32) {
    %c0_i32 = arith.constant 0 : i32
    %c0_i32_0 = arith.constant 0 : i32
    %c0_i32_1 = arith.constant 0 : i32
    %c0_i32_2 = arith.constant 0 : i32
    return %c0_i32, %c0_i32_0, %c0_i32_1 : i32, i32, i32
  }
  func.func @transform_4(%arg0: i32, %arg1: i32) -> (i32, i32, i32) {
    %c0_i32 = arith.constant 0 : i32
    %c0_i32_0 = arith.constant 0 : i32
    %c0_i32_1 = arith.constant 0 : i32
    %c0_i32_2 = arith.constant 0 : i32
    return %c0_i32, %c0_i32_0, %c0_i32_1 : i32, i32, i32
  }
  func.func @transform_5(%arg0: i32, %arg1: i32) -> (i32, i32) {
    %c0_i32 = arith.constant 0 : i32
    %c0_i32_0 = arith.constant 0 : i32
    %c0_i32_1 = arith.constant 0 : i32
    return %c0_i32, %c0_i32_0 : i32, i32
  }
  func.func @transform_6(%arg0: i32, %arg1: i32) -> (i32, i32, i32) {
    %c0_i32 = arith.constant 0 : i32
    %c0_i32_0 = arith.constant 0 : i32
    return %arg0, %arg1, %c0_i32 : i32, i32, i32
  }
}

</mosaic_0001>

<bundles_post_ra>
// kernel: tpu_custom_call.1
= control target key start
LH: loop header
LB: loop body
LE: loop exit
PB: predicated region body
PF: predicated region fallthrough
CT: control target
= control target key end

     0   :  { %11 = vsyncpa [#allocation8], 0  ;;  %s1990_s0 = inlined_call_operand.vmem [shape: f32[2,8,32], index: 0, kind: input, shape index: {}]   ;;  %s1991_s1 = inlined_call_operand.vmem [shape: f32[1,32], index: 1, kind: input, shape index: {}]   ;;  %s1992_s2 = inlined_call_operand.vmem [shape: f32[1,32], index: 2, kind: input, shape index: {}]   ;;  %s1993_s3 = inlined_call_operand.vmem [shape: f32[4,32,8], index: 3, kind: input, shape index: {}]   ;;  %s1994_s4 = inlined_call_operand.vmem [shape: f32[4,32,16], index: 4, kind: input, shape index: {}]   ;;  %s1995_s5 = inlined_call_operand.vmem [shape: f32[32,32], index: 5, kind: input, shape index: {}]   ;;  %s1996_s6 = inlined_call_operand.hbm [shape: f32[2,8,32], index: 6, kind: output, shape index: {}]  }
   0x1   :  { %13 = vsyncpa [#allocation8 + $0x1], 0  ;;  %s1776_s21 = smov 0   ;;  %s1778_s22 = smov 0  }
   0x2   :  { %s1780_s23 = smov 0   ;;  %s1782_s24 = smov 0  }
   0x3   :  { %s1784_s25 = smov 0   ;;  %s1786_s26 = smov 0  }
   0x4 LB: > { %s1367_s27 = sadd.s32 4294967295, %s1717_s26   ;;  %s1368_s28 = sadd.s32 4294967294, %s1717_s26   ;;  %s1717_s26 = sphi %s1786_s26, %s19_s26   ;;  %s1713_s25 = sphi %s1784_s25, %s2003_s25   ;;  %s1709_s24 = sphi %s1782_s24, %s2002_s24   ;;  %s1705_s23 = sphi %s1780_s23, %s2001_s23   ;;  %s1701_s22 = sphi %s1778_s22, %s2000_s22   ;;  %s1697_s21 = sphi %s1776_s21, %s1999_s21  }
   0x5   : > { %s31_s29 = sadd.s32 1, %s1713_s25  ;;  %s171_s30 = sadd.s32 1, %s1705_s23 }
   0x6   : > { %p33_p0 = scmp.ge.s32.totalorder %s31_s29, 2  ;;  %p181_p1 = scmp.ne.s32.totalorder %s1705_s23, %s1701_s22 }
   0x7   : > { %p182_p2 = scmp.eq.s32.totalorder %s1367_s27, 1  ;;  %p187_p3 = scmp.ne.s32.totalorder %s1701_s22, %s1697_s21 }
   0x8   : > { %s2005_s29 = smov (%p33_p0, %s31_s29), 0  ;;  %p188_p5 = scmp.eq.s32.totalorder %s1368_s28, 1 }
   0x9   : > { %p1816_p4 = por %p182_p2, %p181_p1  ;;  %s166_s8 = ssub.s32 %s1713_s25, %s2005_s29 }
   0xa   : > { %p1371_p6 = scmp.ge.s32.totalorder %s1717_s26, 1  ;;  %p169_p7 = scmp.eq.s32.totalorder %s166_s8, 0 }
   0xb   : > { %p1823_p8 = por %p188_p5, %p187_p3  ;;  %p228_p9 = scmp.lt.s32.totalorder %s1717_s26, 3 }
   0xc   : > { %s1829_s10 = scalar_select %p169_p7, %s1705_s23, %s171_s30  }
   0xd   : > { %p229_p10 = pnand %p1371_p6, %p228_p9 }
   0xe   : > { %p257_p11 = scmp.lt.s32.totalorder (!%p229_p10), %s1709_s24, 1  ;;  %vm266_vm0 = vcmask (!%p229_p10), 261120   ;;  %s254_s16 = sand.u32 (!%p229_p10), 1, %s1701_s22   ;;  %v1374_v10 = vld [vmem:[%s1991_s1] ss:$0 sm:$0xff] (!%p229_p10) }
   0xf   : > { %232 = sbr.rel (%p229_p10) target bundleno = 1858 (0x742), region = 44  ;;  %s1841_s17 = sshll.u32 (!%p229_p10), %s254_s16, 3  ;;  %v1375_v13 = vld [vmem:[%s1992_s2] ss:$0 sm:$0xff] (!%p229_p10) }
  0x10   : > { %s256_s28 = scalar_lea.vmem (!%p229_p10), [#allocation7], %s1841_s17  ;;  %s1851_s30 = smov (!%p229_p10), 0  }
  0x16   : > { %s258_s11 = scalar_select %p257_p11, %s1709_s24, 1 }
  0x18   : > { %s1373_s12 = sshll.u32 %s258_s11, 3 }
  0x19   : > { %s260_s15 = scalar_lea.vmem %s1990_s0, %s1373_s12 }
  0x1a   : > { %v265_v0 = vld [vmem:[%s260_s15] sm:$0xff] }
  0x1b   : > { %v267_v1 = vsel %vm266_vm0, %v265_v0, 0.0 }
  0x1c   : > { %268 = vadd.xlane.f32.xlu0 %v267_v1 }
  0xa9   : > { %v269_v2 = vpop.xlane.xlu0 %268 }
  0xaa   : > { %v271_v3 = vmul.f32 0.03125, %v269_v2 }
  0xac   : > { %v272_v4 = vsub.f32 %v265_v0, %v271_v3 }
  0xae   : > { %v273_v5 = vmul.f32 %v272_v4, %v272_v4 }
  0xb0   : > { %v274_v6 = vsel %vm266_vm0, %v273_v5, 0.0 }
  0xb1   : > { %275 = vadd.xlane.f32.xlu0 %v274_v6 }
 0x13e   : > { %v276_v7 = vpop.xlane.xlu0 %275 }
 0x13f   : > { %v277_v8 = vmul.f32 0.03125, %v276_v7 }
 0x141   : > { %v279_v9 = vadd.f32 1e-05, %v277_v8 }
 0x143   : > { %1605 = vrsqrt.f32 %v279_v9 }
 0x14d   : > { %v1606_v11 = vpop.eup %1605 }
 0x14e   : > { %v287_v12 = vmul.f32 %v1606_v11, %v1374_v10 }
 0x150   : > { %v288_v14 = vmul.f32 %v287_v12, %v272_v4 }
 0x152   : > { %v296_v15 = vadd.f32 %v1375_v13, %v288_v14 }
 0x154   : > { %297 = vst.msk [vmem:[#allocation2] sm:$0xff] %vm266_vm0, %v296_v15 }
 0x155 LB: >> { %v1727_v16 = vmov 0.0|0.0   ;;  %vm1728_vm1 = vmmov 0   ;;  %v1729_v17 = vmov 0.0   ;;  %s1376_s8 = sshll.u32 %s1721_s30, 5  ;;  %s1378_s14 = sshll.u32 %s1721_s30, 3  ;;  %vm385_vm2 = vcmask 64512   ;;  %s1721_s30 = sphi %s1851_s30, %s303_s30  }
 0x156   : >> { %1503 = vmatprep.subr.bf16.mxu0 %v1727_v16  ;;  %1438 = vmatprep.mubr.msk.f32.mxu0 %vm1728_vm1, %v1729_v17  ;;  %s305_s13 = scalar_lea.vmem %s1994_s4, %s1376_s8  ;;  %s384_s15 = scalar_lea.vmem [#allocation3], %s1378_s14 }
 0x157   : >> { %v306_v18 = vld [vmem:[%s305_s13] sm:$0xff]  ;;  %v307_v19 = vld [vmem:[%s305_s13 + $0x8] sm:$0xff]  ;;  %v308_v20 = vld [vmem:[%s305_s13 + $0x10] sm:$0xff]  ;;  %s1730_s18 = smov 120   ;;  %s391_s19 = scalar_lea.vmem [#allocation4], %s1378_s14 }
 0x158   : >> { %v1504_v21 = vpack.c.bf16 %v307_v19, %v306_v18  ;;  %v309_v22 = vld [vmem:[%s305_s13 + $0x18] sm:$0xff]  ;;  %s303_s30 = sadd.s32 1, %s1721_s30  }
 0x159   : >> { %v1507_v23 = vpack.c.bf16 %v309_v22, %v308_v20  ;;  %p300_p12 = scmp.ge.s32.totalorder %s303_s30, 4  }
 0x15a   : >> { %1505 = vmatpush3.bf16.msra.mxu0 %v1504_v21  ;;  %s1723_s20 = smov (%p300_p12), 0  }
 0x15b   : >> { %1506 = vmatprep.subr.bf16.mxu0 %v1727_v16  ;;  %v395_v27 = vld [vmem:[#allocation2] sm:$0xff] (%p300_p12) }
 0x15e   : >> { %1508 = vmatpush3.bf16.msra.mxu0 %v1507_v23 }
 0x161   : >> { %1439 = vmatmul.mubr.msk.f32.vlgmr.msra.gmra.mrb[0].mxu0 %vm266_vm0, %v296_v15 }
 0x234   : >> { %v379_v24 = vpop.f32.mrb[0].mxu0 }
 0x235   : >> { %386 = vst.msk [vmem:[%s384_s15] sm:$0xff] %vm385_vm2, %v379_v24  ;;  %v1440_v25 = vpop.f32.mrb[1].mxu0  ;;  %388 = vrot.lane.b32.xlu0 %v379_v24, %s1730_s18 }
 0x2a2   : > { %302 = sbr.rel (!%p300_p12) target bundleno = 341 (0x155), region = 103 }
 0x2a7   : >> { %v389_v26 = vpop.permute.xlu0 %388 }
 0x2a8   : >> { %392 = vst.msk [vmem:[%s391_s19] sm:$0xff] %vm385_vm2, %v389_v26 }
 0x2a9 LB: >> { %v1731_v28 = vmov 0.0|0.0   ;;  %vm1732_vm3 = vmmov 0   ;;  %v1733_v29 = vmov 0.0   ;;  %s1379_s27 = sshll.u32 %s1725_s20, 5  ;;  %s1381_s30 = sshll.u32 %s1725_s20, 3  ;;  %s1725_s20 = sphi %s1723_s20, %s401_s20  }
 0x2aa   : >> { %1509 = vmatprep.subr.bf16.mxu0 %v1731_v28  ;;  %1449 = vmatprep.mubr.msk.f32.mxu0 %vm1732_vm3, %v1733_v29  ;;  %s403_s12 = scalar_lea.vmem %s1993_s3, %s1379_s27  ;;  %s483_s13 = scalar_lea.vmem [#allocation5], %s1381_s30 }
 0x2ab   : >> { %v404_v30 = vld [vmem:[%s403_s12] sm:$0xff]  ;;  %v405_v31 = vld [vmem:[%s403_s12 + $0x8] sm:$0xff]  ;;  %v406_v32 = vld [vmem:[%s403_s12 + $0x10] sm:$0xff]  ;;  %s401_s20 = sadd.s32 1, %s1725_s20  }
 0x2ac   : >> { %v1510_v33 = vpack.c.bf16 %v405_v31, %v404_v30  ;;  %v407_v34 = vld [vmem:[%s403_s12 + $0x18] sm:$0xff]  ;;  %p398_p13 = scmp.ge.s32.totalorder %s401_s20, 4  }
 0x2ad   : >> { %v1513_v35 = vpack.c.bf16 %v407_v34, %v406_v32  ;;  %v490_v38 = vld [vmem:[#allocation3] sm:$0xff] (%p398_p13)  ;;  %v492_v39 = vld [vmem:[#allocation3 + $0x10] sm:$0xff] (%p398_p13)  ;;  %v1734_v40 = vmov (%p398_p13), 0.0   ;;  %vm1735_vm4 = vmmov (%p398_p13), 0   ;;  %v491_v43 = vld [vmem:[#allocation3 + $0x8] sm:$0xff] (%p398_p13)  ;;  %s1737_s12 = smov (%p398_p13), 8  }
 0x2ae   : >> { %1511 = vmatpush3.bf16.msra.mxu0 %v1510_v33  ;;  %1452 = vmatprep.subr.mxu1 (%p398_p13), %v1734_v40  ;;  %v493_v45 = vld [vmem:[#allocation3 + $0x18] sm:$0xff] (%p398_p13)  ;;  %s1738_s30 = smov (%p398_p13), 16   ;;  %vm1168_vm5 = vcmask (%p398_p13), 130112   ;;  %vm1174_vm6 = vcmask (%p398_p13), 195712   ;;  %vm1180_vm7 = vcmask (%p398_p13), 261312   ;;  %s1396_s14 = sshll.u32 (%p398_p13), %s1709_s24, 7 }
 0x2af   : >> { %1512 = vmatprep.subr.bf16.mxu0 %v1731_v28  ;;  %1453 = vmatpush3.xpose.msk.msra.mxu1 (%p398_p13), %vm385_vm2, %v490_v38  ;;  %v494_v59 = vld [vmem:[#allocation4] sm:$0xff] (%p398_p13)  ;;  %v495_v60 = vld [vmem:[#allocation4 + $0x8] sm:$0xff] (%p398_p13)  ;;  %v496_v10 = vld [vmem:[#allocation4 + $0x10] sm:$0xff] (%p398_p13)  ;;  %s1277_s15 = sshll.u32 (%p398_p13), %s256_s28, 4  ;;  %s1938_s20 = scalar_lea.hbm (%p398_p13), %s1996_s6, %s1396_s14  ;;  %s1940_s15 = int_to_ptr.vmem [resolvable:$true] %s1277_s15 }
 0x2b0   : > { %1454 = vmatprep.mubr.msk.f32.mxu1 (%p398_p13), %vm1735_vm4, %v1734_v40  ;;  %1457 = vmatprep.subr.mxu1 (%p398_p13), %v1734_v40  ;;  %v497_v13 = vld [vmem:[#allocation4 + $0x18] sm:$0xff] (%p398_p13)  ;;  %s1263_s27 = scalar_lea.sflag (%p398_p13), [#allocation8], %s254_s16  ;;  %s1631_s24 = scalar_lea.vmem (%p398_p13), %s1940_s15, 128 }
 0x2b1   : > { %p1632_p0 = scmp.ne.s32.totalorder (%p398_p13), %s1940_s15, %s1631_s24  ;;  %s1740_s8 = smov (%p398_p13), [#allocation7]  }
 0x2b2   : >> { %1514 = vmatpush3.bf16.msra.mxu0 %v1513_v35  ;;  %s1635_s11 = sshll.u32 (%p398_p13), %s1740_s8, 4  ;;  %s1636_s11 = int_to_ptr.vmem [resolvable:$false] %s1635_s11 }
 0x2b3   : > { %1462 = vmatprep.subr.mxu0 (%p398_p13), %v1734_v40  ;;  %p1633_p1 = pnand (%p398_p13), %p1632_p0, %p1816_p4  ;;  %p1638_p3 = scmp.lt.s32.totalorder (%p398_p13), %s1940_s15, %s1636_s11 }
 0x2b5   : >> { %1450 = vmatmul.mubr.msk.f32.vlgmr.msra.gmra.mrb[0].mxu0 %vm266_vm0, %v395_v27  ;;  %p1634_p2 = pneg (%p398_p13), %p1633_p1 }
 0x2b6   : > { %1464 = vmatprep.mubr.msk.f32.mxu0 (%p398_p13), %vm1735_vm4, %v1734_v40 }
 0x2bb   : > { %1463 = vmatpush3.xpose.msk.msra.mxu0 (%p398_p13), %vm385_vm2, %v492_v39 }
 0x2bc   : > { %1472 = vmatprep.subr.mxu0 (%p398_p13), %v1734_v40 }
 0x383   : > { %400 = sbr.rel (!%p398_p13) target bundleno = 681 (0x2a9), region = 114 }
 0x388   : >> { %v478_v36 = vpop.f32.mrb[0].mxu0 }
 0x389   : >> { %485 = vst.msk [vmem:[%s483_s13] sm:$0xff] %vm385_vm2, %v478_v36  ;;  %v1451_v37 = vpop.f32.mrb[1].mxu0  ;;  %s1739_s13 = smov (%p398_p13), 24  }
 0x390   : > { %v486_v41 = vld [vmem:[#allocation5] sm:$0xff]  ;;  %v488_v42 = vld [vmem:[#allocation5 + $0x10] sm:$0xff]  ;;  %v487_v44 = vld [vmem:[#allocation5 + $0x8] sm:$0xff] }
 0x391   : > { %1455 = vmatmul.mubr.msk.f32.vlgmr.msra.gmra.mrb[0].mxu1 %vm385_vm2, %v486_v41  ;;  %1465 = vmatmul.mubr.msk.f32.vlgmr.msra.gmra.mrb[0].mxu0 %vm385_vm2, %v488_v42  ;;  %v489_v46 = vld [vmem:[#allocation5 + $0x18] sm:$0xff] }
 0x392   : > { %1458 = vmatpush3.xpose.msk.msra.mxu1 %vm385_vm2, %v491_v43  ;;  %1459 = vmatprep.mubr.msk.f32.mxu1 %vm1735_vm4, %v1734_v40  ;;  %v1183_v43 = vld [vmem:[%s1995_s5] sm:$0xff] }
 0x393   : > { %1467 = vmatprep.subr.mxu1 %v1734_v40  ;;  %1474 = vmatprep.mubr.msk.f32.mxu0 %vm1735_vm4, %v1734_v40 }
 0x394   : > { %1473 = vmatpush3.msra.mxu0 %v494_v59 }
 0x395   : > { %1460 = vmatmul.mubr.msk.f32.vlgmr.msra.gmra.mrb[2].mxu1 %vm385_vm2, %v487_v44  ;;  %1482 = vmatprep.subr.mxu0 %v1734_v40  ;;  %v1184_v44 = vld [vmem:[%s1995_s5 + $0x8] sm:$0xff] }
 0x396   : > { %1468 = vmatpush3.xpose.msk.msra.mxu1 %vm385_vm2, %v493_v45  ;;  %1469 = vmatprep.mubr.msk.f32.mxu1 %vm1735_vm4, %v1734_v40  ;;  %v1516_v45 = vpack.c.bf16 %v1184_v44, %v1183_v43 }
 0x397   : > { %1477 = vmatprep.subr.mxu1 %v1734_v40 }
 0x399   : > { %1470 = vmatmul.mubr.msk.f32.vlgmr.msra.gmra.mrb[4].mxu1 %vm385_vm2, %v489_v46 }
 0x39a   : > { %1479 = vmatprep.mubr.msk.f32.mxu1 %vm1735_vm4, %v1734_v40  ;;  %1478 = vmatpush3.msra.mxu1 %v495_v60 }
 0x39b   : > { %1487 = vmatprep.subr.mxu1 %v1734_v40 }
 0x464   : > { %v571_v47 = vpop.f32.mrb[0].mxu1  ;;  %v723_v48 = vpop.f32.mrb[0].mxu0 }
 0x465   : > { %v1456_v49 = vpop.f32.mrb[1].mxu1  ;;  %v809_v50 = vsel %vm385_vm2, %v723_v48, -inf  ;;  %v803_v51 = vsel %vm385_vm2, %v571_v47, -inf  ;;  %v1466_v52 = vpop.f32.mrb[1].mxu0 }
 0x466   : > { %810 = vmax.xlane.f32.xlu1 %v809_v50  ;;  %804 = vmax.xlane.f32.xlu0 %v803_v51  ;;  %v1186_v49 = vld [vmem:[%s1995_s5 + $0x18] sm:$0xff] }
 0x468   : > { %v647_v53 = vpop.f32.mrb[2].mxu1 }
 0x469   : > { %v1461_v54 = vpop.f32.mrb[3].mxu1  ;;  %v806_v55 = vsel %vm385_vm2, %v647_v53, -inf }
 0x46a   : > { %807 = vmax.xlane.f32.xlu0 %v806_v55 }
 0x46c   : > { %v799_v56 = vpop.f32.mrb[4].mxu1 }
 0x46d   : > { %v1471_v57 = vpop.f32.mrb[5].mxu1  ;;  %v812_v58 = vsel %vm385_vm2, %v799_v56, -inf }
 0x46e   : > { %813 = vmax.xlane.f32.xlu1 %v812_v58 }
 0x4f3   : > { %v811_v61 = vpop.xlane.xlu1 %810  ;;  %v805_v62 = vpop.xlane.xlu0 %804 }
 0x4f4   : > { %v829_v63 = vsub.f32 %v723_v48, %v811_v61  ;;  %v827_v0 = vsub.f32 %v571_v47, %v805_v62  ;;  %v815_v19 = vsub.f32 -inf, %v805_v62  ;;  %v817_v21 = vsub.f32 -inf, %v811_v61  ;;  %v1185_v48 = vld [vmem:[%s1995_s5 + $0x10] sm:$0xff] }
 0x4f5   : > { %v1736_v47 = vmov 0.0|0.0   ;;  %v1519_v52 = vpack.c.bf16 %v1186_v49, %v1185_v48 }
 0x4f6   : > { %v835_v1 = vmul.f32 1.442695, %v829_v63  ;;  %v831_v2 = vmul.f32 1.442695, %v827_v0  ;;  %v819_v22 = vmul.f32 1.442695, %v815_v19 }
 0x4f7   : > { %v808_v3 = vpop.xlane.xlu0 %807  ;;  %v823_v25 = vmul.f32 1.442695, %v817_v21 }
 0x4f8   : > { %v828_v4 = vsub.f32 %v647_v53, %v808_v3  ;;  %1607 = vpow2.f32 %v835_v1  ;;  %v816_v20 = vsub.f32 -inf, %v808_v3 }
 0x4f9   : > { %1609 = vpow2.f32 %v831_v2 }
 0x4fa   : > { %v833_v5 = vmul.f32 1.442695, %v828_v4  ;;  %v821_v23 = vmul.f32 1.442695, %v816_v20 }
 0x4fb   : > { %v814_v6 = vpop.xlane.xlu1 %813 }
 0x4fc   : > { %v830_v7 = vsub.f32 %v799_v56, %v814_v6  ;;  %1611 = vpow2.f32 %v833_v5  ;;  %v818_v24 = vsub.f32 -inf, %v814_v6 }
 0x4fe   : > { %v837_v8 = vmul.f32 1.442695, %v830_v7  ;;  %v825_v26 = vmul.f32 1.442695, %v818_v24 }
 0x500   : > { %1613 = vpow2.f32 %v837_v8 }
 0x501   : > { %1615 = vpow2.f32 %v819_v22 }
 0x502   : > { %v1608_v9 = vpop.eup %1607  ;;  %1617 = vpow2.f32 %v821_v23 }
 0x503   : > { %v849_v11 = vsel %vm385_vm2, %v1608_v9, 0.0  ;;  %v1610_v12 = vpop.eup %1609  ;;  %1619 = vpow2.f32 %v823_v25 }
 0x504   : > { %850 = vadd.xlane.f32.xlu1 %v849_v11  ;;  %1475 = vmatmul.mubr.msk.f32.vlgmr.msra.gmra.mrb[2].mxu0 %vm385_vm2, %v1610_v12  ;;  %v843_v16 = vsel %vm385_vm2, %v1610_v12, 0.0  ;;  %1621 = vpow2.f32 %v825_v26 }
 0x505   : > { %1483 = vmatpush3.msra.mxu0 %v496_v10  ;;  %1484 = vmatprep.mubr.msk.f32.mxu0 %vm1735_vm4, %v1734_v40 }
 0x506   : > { %v1612_v14 = vpop.eup %1611  ;;  %1515 = vmatprep.subr.bf16.mxu0 %v1736_v47 }
 0x507   : > { %1480 = vmatmul.mubr.msk.f32.vlgmr.msra.gmra.mrb[6].mxu1 %vm385_vm2, %v1612_v14  ;;  %v846_v15 = vsel %vm385_vm2, %v1612_v14, 0.0 }
 0x508   : > { %1488 = vmatpush3.msra.mxu1 %v497_v13  ;;  %847 = vadd.xlane.f32.xlu0 %v846_v15 }
 0x509   : > { %1485 = vmatmul.mubr.msk.f32.vlgmr.msra.gmra.mrb[4].mxu0 %vm385_vm2, %v1608_v9  ;;  %844 = vadd.xlane.f32.xlu1 %v843_v16 }
 0x50a   : > { %v1614_v17 = vpop.eup %1613  ;;  %1489 = vmatprep.mubr.msk.f32.mxu1 %vm1735_vm4, %v1734_v40  ;;  %1500 = vmatprep.mubr.msk.f32.mxu0 %vm1735_vm4, %v1734_v40 }
 0x50b   : > { %1490 = vmatmul.mubr.msk.f32.vlgmr.msra.gmra.mrb[8].mxu1 %vm385_vm2, %v1614_v17  ;;  %v852_v18 = vsel %vm385_vm2, %v1614_v17, 0.0  ;;  %v1616_v28 = vpop.eup %1615  ;;  %1517 = vmatpush3.bf16.msra.mxu0 %v1516_v45 }
 0x50c   : > { %853 = vadd.xlane.f32.xlu0 %v852_v18  ;;  %v1618_v29 = vpop.eup %1617  ;;  %v839_v32 = vmul.f32 0.0, %v1616_v28  ;;  %1518 = vmatprep.subr.bf16.mxu0 %v1736_v47 }
 0x50d   : > { %v1620_v33 = vpop.eup %1619  ;;  %v840_v34 = vmul.f32 0.0, %v1618_v29 }
 0x50e   : > { %v1622_v36 = vpop.eup %1621  ;;  %v841_v37 = vmul.f32 0.0, %v1620_v33 }
 0x50f   : > { %v842_v41 = vmul.f32 0.0, %v1622_v36  ;;  %1520 = vmatpush3.bf16.msra.mxu0 %v1519_v52 }
 0x591   : > { %v851_v27 = vpop.xlane.xlu1 %850 }
 0x592   : > { %v857_v40 = vadd.f32 %v851_v27, %v841_v37 }
 0x595   : > { %v848_v30 = vpop.xlane.xlu0 %847 }
 0x596   : > { %v845_v31 = vpop.xlane.xlu1 %844  ;;  %v856_v38 = vadd.f32 %v848_v30, %v840_v34 }
 0x597   : > { %v855_v35 = vadd.f32 %v845_v31, %v839_v32 }
 0x599   : > { %v854_v39 = vpop.xlane.xlu0 %853  ;;  %1623 = vrcp.f32 %v855_v35 }
 0x59a   : > { %1625 = vrcp.f32 %v856_v38  ;;  %v858_v42 = vadd.f32 %v854_v39, %v842_v41 }
 0x59b   : > { %1627 = vrcp.f32 %v857_v40 }
 0x59c   : > { %1629 = vrcp.f32 %v858_v42 }
 0x5a3   : > { %v1624_v53 = vpop.eup %1623 }
 0x5a4   : > { %v1626_v58 = vpop.eup %1625 }
 0x5a5   : > { %v1628_v63 = vpop.eup %1627 }
 0x5a6   : > { %v1630_v4 = vpop.eup %1629 }
 0x5d7   : > { %v928_v46 = vpop.f32.mrb[2].mxu0 }
 0x5d8   : > { %v1151_v50 = vadd.f32 %v928_v46, %v839_v32  ;;  %v1476_v51 = vpop.f32.mrb[3].mxu0 }
 0x5da   : > { %v1001_v54 = vpop.f32.mrb[6].mxu1  ;;  %v1159_v55 = vmul.f32 %v1624_v53, %v1151_v50 }
 0x5db   : > { %v1152_v56 = vadd.f32 %v1001_v54, %v840_v34  ;;  %v1481_v57 = vpop.f32.mrb[7].mxu1 }
 0x5dc   : > { %v1074_v59 = vpop.f32.mrb[4].mxu0  ;;  %1163 = vst.msk [vmem:[#allocation6] sm:$0xff] %vm385_vm2, %v1159_v55 }
 0x5dd   : > { %v1160_v60 = vmul.f32 %v1626_v58, %v1152_v56  ;;  %v1153_v61 = vadd.f32 %v1074_v59, %v841_v37  ;;  %v1486_v62 = vpop.f32.mrb[5].mxu0 }
 0x5de   : > { %v1147_v0 = vpop.f32.mrb[8].mxu1 }
 0x5df   : > { %v1161_v1 = vmul.f32 %v1628_v63, %v1153_v61  ;;  %v1154_v2 = vadd.f32 %v1147_v0, %v842_v41  ;;  %1165 = vrot.lane.b32.xlu0 %v1160_v60, %s1737_s12  ;;  %v1491_v3 = vpop.f32.mrb[9].mxu1  ;;  %s1637_s12 = scalar_lea.vmem %s1636_s11, 256 }
 0x5e0   : > { %p1639_p5 = scmp.lt.s32.totalorder %s1637_s12, %s1631_s24 }
 0x5e1   : > { %v1162_v5 = vmul.f32 %v1630_v4, %v1154_v2  ;;  %1171 = vrot.lane.b32.xlu1 %v1161_v1, %s1738_s30 }
 0x5e2   : > { %p1640_p6 = por %p1639_p5, %p1638_p3 }
 0x5e4   : > { %p1641_p7 = pnand %p1640_p6, %p1634_p2 }
 0x5e5   : > { %1177 = vrot.lane.b32.xlu1 %v1162_v5, %s1739_s13 }
 0x651   : > { %v1166_v6 = vpop.permute.xlu0 %1165 }
 0x652   : > { %1169 = vst.msk [vmem:[#allocation6] sm:$0xff] %vm1168_vm5, %v1166_v6 }
 0x653   : > { %v1172_v7 = vpop.permute.xlu1 %1171 }
 0x654   : > { %1175 = vst.msk [vmem:[#allocation6] sm:$0xff] %vm1174_vm6, %v1172_v7 }
 0x657   : > { %v1178_v8 = vpop.permute.xlu1 %1177 }
 0x658   : > { %1181 = vst.msk [vmem:[#allocation6] sm:$0xff] %vm1180_vm7, %v1178_v8 }
 0x65f   : > { %v1182_v9 = vld [vmem:[#allocation6] sm:$0xff] }
 0x660   : > { %1501 = vmatmul.mubr.msk.f32.vlgmr.msra.gmra.mrb[6].mxu0 %vm266_vm0, %v1182_v9 }
 0x733   : > { %v1257_v10 = vpop.f32.mrb[6].mxu0 }
 0x734   : > { %1261 = vst.msk [vmem:[%s256_s28] sm:$0xff] %vm266_vm0, %v1257_v10  ;;  %v1502_v11 = vpop.f32.mrb[7].mxu0 }
 0x735   : > { %1644 = shalt.err (!%p1641_p7)
}
 0x736   : > { %s1645_s16 = scalar_lea.hbm %s1938_s20, 128  ;;  %s1649_s30 = scalar_lea.hbm %s1996_s6, 256 }
 0x737   : > { %p1646_p9 = scmp.ne.s32.totalorder %s1938_s20, %s1645_s16  ;;  %p1650_p12 = scmp.lt.u32.totalorder %s1938_s20, %s1996_s6 }
 0x738   : > { %p1651_p13 = scmp.lt.u32.totalorder %s1649_s30, %s1645_s16  ;;  %p1653_p1 = scmp.lt.u32.totalorder %s1645_s16, %s1938_s20 }
 0x739   : > { %p1647_p10 = pnand %p1646_p9, %p1816_p4 }
 0x73a   : > { %p1652_p0 = por %p1651_p13, %p1650_p12 }
 0x73b   : > { %p1648_p11 = pneg %p1647_p10 }
 0x73c   : > { %p1654_p2 = por %p1653_p1, %p1652_p0 }
 0x73e   : > { %p1655_p3 = pnand %p1654_p2, %p1648_p11 }
 0x740   : > { %1658 = shalt.err (!%p1655_p3)
}
 0x741   : > { %1521 = dma.vmem_to_hbm [thread:$0]  (%p1816_p4), %s1940_s15, 128, %s1938_s20, %s1263_s27  }
 0x742 PF: > { %p1527_p5 = scmp.ge.s32.totalorder %s1717_s26, 2  ;;  %s1289_s18 = sand.u32 1, %s1697_s21  }
 0x743   : > { %s1290_s19 = scalar_lea.sflag [#allocation8], %s1289_s18 }
 0x744   : > { %p1524_p6 = pnand %p1527_p5, %p1823_p8 }
 0x746   : > { %1692 = dma.done.wait (!%p1524_p6), %s1290_s19, 128  }
 0x747   : > { %1694 = vsyncadd (!%p1524_p6), %s1290_s19, 4294967168  ;;  %s19_s26 = sadd.s32 1, %s1717_s26   ;;  %s1999_s21 = smov %s1701_s22 }
 0x748   : > { %p16_p7 = scmp.ge.s32.totalorder %s19_s26, 4   ;;  %s2000_s22 = smov %s1705_s23 }
 0x749   : > { %s2001_s23 = smov %s1829_s10  ;;  %s2002_s24 = smov %s1713_s25 }
 0x74a   : > { %s2003_s25 = smov %s2005_s29  ;;  %18 = sbr.rel (!%p16_p7) target bundleno = 4 (0x4), region = 125 }
 0x751   :  { %1295 = vsyncpa [#allocation8], 1 }
 0x752   :  { %1297 = vsyncpa [#allocation8 + $0x1], 1 }

</bundles_post_ra>
